<compile_context>
chip_gen: v5e
topology: v5e:2x2
jax: 0.10.0
libtpu: 0.0.40
codegen_flags: <defaults>
</compile_context>

<pallas_src>
import jax
import jax.numpy as jnp
from jax.experimental import pallas as pl
from jax.experimental.pallas import tpu as pltpu


# Logical dims of the PyTorch Net and lane-padded dims used inside the kernel.
D_IN, H1, H2, H3, D_OUT = 42, 200, 200, 32, 2
H1_P, H2_P, H3_P, D_OUT_P = 256, 256, 128, 128


def mlp_kernel(x_ref, w1_ref, b1_ref, w2_ref, b2_ref,
               w3_ref, b3_ref, w4_ref, b4_ref, o_ref):
    # One batch tile; weights/biases are VMEM-resident (constant index_maps).
    # x arrives unpadded (TM, 42) f32; cast to bf16 for the MXU (VPU filler).
    x = x_ref[...].astype(jnp.bfloat16)

    h = jnp.dot(x, w1_ref[...], preferred_element_type=jnp.float32) + b1_ref[...]
    h = jnp.maximum(h, 0.0).astype(jnp.bfloat16)                 # (TM, 256)

    h = jnp.dot(h, w2_ref[...], preferred_element_type=jnp.float32) + b2_ref[...]
    h = jnp.maximum(h, 0.0).astype(jnp.bfloat16)                 # (TM, 256)

    h = jnp.dot(h, w3_ref[...], preferred_element_type=jnp.float32) + b3_ref[...]
    h = jnp.maximum(h, 0.0).astype(jnp.bfloat16)                 # (TM, 128)

    h = jnp.dot(h, w4_ref[...], preferred_element_type=jnp.float32) + b4_ref[...]
    o_ref[...] = h.astype(o_ref.dtype)                           # (TM, 128) bf16, lane-dense


def _round_up(n, m):
    return ((n + m - 1) // m) * m


def _pad2(a, rows, cols):
    return jnp.pad(a, ((0, rows - a.shape[0]), (0, cols - a.shape[1])))


def prepare_params(params):
    """One-time weight preparation: zero-pad to lane-friendly dims and cast
    weights to bf16 (zero padding keeps padded lanes exactly zero through
    bias + ReLU).  Call once at model-load time, not per forward."""
    return dict(
        w1=_pad2(params["w1"], D_IN, H1_P).astype(jnp.bfloat16),   # (42, 256)
        w2=_pad2(params["w2"], H1_P, H2_P).astype(jnp.bfloat16),   # (256, 256)
        w3=_pad2(params["w3"], H2_P, H3_P).astype(jnp.bfloat16),   # (256, 128)
        w4=_pad2(params["w4"], H3_P, D_OUT_P).astype(jnp.bfloat16),# (128, 128)
        b1=_pad2(params["b1"], 1, H1_P),                           # f32 biases
        b2=_pad2(params["b2"], 1, H2_P),
        b3=_pad2(params["b3"], 1, H3_P),
        b4=_pad2(params["b4"], 1, D_OUT_P),
    )


def net_forward(x, prepared, tm=1024):
    """x: (B, 42) float32.  prepared: output of prepare_params()."""
    B = x.shape[0]
    B8 = _round_up(B, 8)

    if B8 <= tm:
        # Small batch: one big tile, grid collapses to a single step.
        TM = B8
    else:
        # Large batch: aim for an even number of grid steps so v7x's two
        # TensorCores share the "parallel" batch axis evenly.
        n = pl.cdiv(B8, tm)
        if n % 2 == 1:
            n += 1
        TM = _round_up(pl.cdiv(B8, n), 8)

    B_pad = _round_up(B8, TM)
    grid = (B_pad // TM,)

    # Only batch-row padding; no lane pad, no wrapper-side cast of x.
    xp = jnp.pad(x, ((0, B_pad - B), (0, 0))) if B_pad != B else x

    w1, w2, w3, w4 = prepared["w1"], prepared["w2"], prepared["w3"], prepared["w4"]
    b1, b2, b3, b4 = prepared["b1"], prepared["b2"], prepared["b3"], prepared["b4"]

    # Weights/biases: constant index_map -> DMA'd once, VMEM-resident.
    const = lambda a: pl.BlockSpec(a.shape, lambda i: (0, 0))

    weight_bytes = sum(int(w.size) * 2 for w in (w1, w2, w3, w4)) + \
                   sum(int(b.size) * 4 for b in (b1, b2, b3, b4))
    cost = pl.CostEstimate(
        flops=2 * B_pad * (D_IN * H1_P + H1_P * H2_P + H2_P * H3_P + H3_P * D_OUT_P),
        transcendentals=0,
        bytes_accessed=B_pad * D_IN * 4 + B_pad * D_OUT_P * 2 + weight_bytes,
    )

    out = pl.pallas_call(
        mlp_kernel,
        out_shape=jax.ShapeDtypeStruct((B_pad, D_OUT_P), jnp.bfloat16),
        grid=grid,
        in_specs=[
            pl.BlockSpec((TM, D_IN), lambda i: (i, 0)),   # (TM, 42) f32, full last dim
            const(w1), const(b1),
            const(w2), const(b2),
            const(w3), const(b3),
            const(w4), const(b4),
        ],
        out_specs=pl.BlockSpec((TM, D_OUT_P), lambda i: (i, 0)),
        compiler_params=pltpu.CompilerParams(
            dimension_semantics=("parallel",)),
        cost_estimate=cost,
    )(xp, w1, b1, w2, b2, w3, b3, w4, b4)

    # Slice away batch padding + lane padding; return f32 like the PyTorch Net.
    return out[:B, :D_OUT].astype(jnp.float32)


def init_params(key):
    """PyTorch nn.Linear default init (uniform +/- 1/sqrt(fan_in)).
    Weights stored as (in_dim, out_dim) = PyTorch weight transposed."""
    dims = [(D_IN, H1), (H1, H2), (H2, H3), (H3, D_OUT)]
    params = {}
    for i, (fan_in, fan_out) in enumerate(dims, start=1):
        key, kw, kb = jax.random.split(key, 3)
        bound = 1.0 / jnp.sqrt(fan_in)
        params[f"w{i}"] = jax.random.uniform(
            kw, (fan_in, fan_out), jnp.float32, -bound, bound)
        params[f"b{i}"] = jax.random.uniform(
            kb, (1, fan_out), jnp.float32, -bound, bound)
    return params


if __name__ == "__main__":
    key = jax.random.PRNGKey(0)
    key, kx = jax.random.split(key)

    # Small batch: B=100 exercises row padding (100 -> 104) and the
    # single-step grid path (TM = 104, grid = (1,)).
    B = 100
    x = jax.random.normal(kx, (B, D_IN), jnp.float32)
    params = init_params(key)
    prepared = prepare_params(params)          # one-time weight prep (hoisted)

    out = net_forward(x, prepared)
    out = jax.block_until_ready(out)

    # Reference in plain JAX with the same bf16-weight / f32-accumulate math.
    def ref(x, p):
        h = x.astype(jnp.bfloat16)
        h = jnp.maximum(jnp.dot(h, p["w1"].astype(jnp.bfloat16),
                                preferred_element_type=jnp.float32) + p["b1"], 0.0)
        h = h.astype(jnp.bfloat16)
        h = jnp.maximum(jnp.dot(h, p["w2"].astype(jnp.bfloat16),
                                preferred_element_type=jnp.float32) + p["b2"], 0.0)
        h = h.astype(jnp.bfloat16)
        h = jnp.maximum(jnp.dot(h, p["w3"].astype(jnp.bfloat16),
                                preferred_element_type=jnp.float32) + p["b3"], 0.0)
        h = h.astype(jnp.bfloat16)
        return jnp.dot(h, p["w4"].astype(jnp.bfloat16),
                       preferred_element_type=jnp.float32) + p["b4"]

    expected = ref(x, params)
    assert out.shape == (B, D_OUT), out.shape
    # Kernel output passes through one bf16 rounding on the final layer.
    assert jnp.allclose(out, expected, atol=2e-2, rtol=2e-2), (
        float(jnp.max(jnp.abs(out - expected))))

    print("KERNEL_OK")
</pallas_src>

<mosaic_0001>
module attributes {stable_mosaic.version = 11 : i64} {
  func.func @mlp_kernel(%arg0: i32, %arg1: memref<104x42xf32, #tpu.memory_space<vmem>>, %arg2: memref<42x256xbf16, #tpu.memory_space<vmem>>, %arg3: memref<1x256xf32, #tpu.memory_space<vmem>>, %arg4: memref<256x256xbf16, #tpu.memory_space<vmem>>, %arg5: memref<1x256xf32, #tpu.memory_space<vmem>>, %arg6: memref<256x128xbf16, #tpu.memory_space<vmem>>, %arg7: memref<1x128xf32, #tpu.memory_space<vmem>>, %arg8: memref<128x128xbf16, #tpu.memory_space<vmem>>, %arg9: memref<1x128xf32, #tpu.memory_space<vmem>>, %arg10: memref<104x128xbf16, #tpu.memory_space<vmem>>) attributes {dimension_semantics = [#tpu.dimension_semantics<parallel>], iteration_bounds = array<i64: 1>, scalar_prefetch = 0 : i64, scratch_operands = 0 : i64, tpu.core_type = #tpu.core_type<tc>, window_params = [{transform_indices = @transform_0, window_bounds = array<i64: 104, 42>}, {pipeline_mode = #tpu.pipeline_mode<synchronous>, transform_indices = @transform_1, window_bounds = array<i64: 42, 256>}, {pipeline_mode = #tpu.pipeline_mode<synchronous>, transform_indices = @transform_2, window_bounds = array<i64: 1, 256>}, {pipeline_mode = #tpu.pipeline_mode<synchronous>, transform_indices = @transform_3, window_bounds = array<i64: 256, 256>}, {pipeline_mode = #tpu.pipeline_mode<synchronous>, transform_indices = @transform_4, window_bounds = array<i64: 1, 256>}, {pipeline_mode = #tpu.pipeline_mode<synchronous>, transform_indices = @transform_5, window_bounds = array<i64: 256, 128>}, {pipeline_mode = #tpu.pipeline_mode<synchronous>, transform_indices = @transform_6, window_bounds = array<i64: 1, 128>}, {pipeline_mode = #tpu.pipeline_mode<synchronous>, transform_indices = @transform_7, window_bounds = array<i64: 128, 128>}, {pipeline_mode = #tpu.pipeline_mode<synchronous>, transform_indices = @transform_8, window_bounds = array<i64: 1, 128>}, {transform_indices = @transform_9, window_bounds = array<i64: 104, 128>}]} {
    %c0 = arith.constant 0 : index
    %c0_0 = arith.constant 0 : index
    %0 = vector.load %arg1[%c0, %c0_0] : memref<104x42xf32, #tpu.memory_space<vmem>>, vector<104x42xf32>
    %1 = arith.truncf %0 : vector<104x42xf32> to vector<104x42xbf16>
    %c0_1 = arith.constant 0 : index
    %c0_2 = arith.constant 0 : index
    %2 = vector.load %arg2[%c0_1, %c0_2] : memref<42x256xbf16, #tpu.memory_space<vmem>>, vector<42x256xbf16>
    %cst = arith.constant dense<0.000000e+00> : vector<104x256xf32>
    %3 = tpu.matmul %1, %2, %cst {dimension_numbers = #tpu.dot_dimension_numbers<[1], [0], [0], [1], [0, 0, 1, 1], [], []>} : vector<104x42xbf16>, vector<42x256xbf16>, vector<104x256xf32> -> vector<104x256xf32>
    %c0_3 = arith.constant 0 : index
    %c0_4 = arith.constant 0 : index
    %4 = vector.load %arg3[%c0_3, %c0_4] : memref<1x256xf32, #tpu.memory_space<vmem>>, vector<1x256xf32>
    %5 = vector.broadcast %4 : vector<1x256xf32> to vector<104x256xf32>
    %6 = arith.addf %3, %5 : vector<104x256xf32>
    %cst_5 = arith.constant 0.000000e+00 : f32
    %7 = vector.broadcast %cst_5 : f32 to vector<104x256xf32>
    %8 = arith.maximumf %6, %7 : vector<104x256xf32>
    %9 = arith.truncf %8 : vector<104x256xf32> to vector<104x256xbf16>
    %c0_6 = arith.constant 0 : index
    %c0_7 = arith.constant 0 : index
    %10 = vector.load %arg4[%c0_6, %c0_7] : memref<256x256xbf16, #tpu.memory_space<vmem>>, vector<256x256xbf16>
    %cst_8 = arith.constant dense<0.000000e+00> : vector<104x256xf32>
    %11 = tpu.matmul %9, %10, %cst_8 {dimension_numbers = #tpu.dot_dimension_numbers<[1], [0], [0], [1], [0, 0, 1, 1], [], []>} : vector<104x256xbf16>, vector<256x256xbf16>, vector<104x256xf32> -> vector<104x256xf32>
    %c0_9 = arith.constant 0 : index
    %c0_10 = arith.constant 0 : index
    %12 = vector.load %arg5[%c0_9, %c0_10] : memref<1x256xf32, #tpu.memory_space<vmem>>, vector<1x256xf32>
    %13 = vector.broadcast %12 : vector<1x256xf32> to vector<104x256xf32>
    %14 = arith.addf %11, %13 : vector<104x256xf32>
    %cst_11 = arith.constant 0.000000e+00 : f32
    %15 = vector.broadcast %cst_11 : f32 to vector<104x256xf32>
    %16 = arith.maximumf %14, %15 : vector<104x256xf32>
    %17 = arith.truncf %16 : vector<104x256xf32> to vector<104x256xbf16>
    %c0_12 = arith.constant 0 : index
    %c0_13 = arith.constant 0 : index
    %18 = vector.load %arg6[%c0_12, %c0_13] : memref<256x128xbf16, #tpu.memory_space<vmem>>, vector<256x128xbf16>
    %cst_14 = arith.constant dense<0.000000e+00> : vector<104x128xf32>
    %19 = tpu.matmul %17, %18, %cst_14 {dimension_numbers = #tpu.dot_dimension_numbers<[1], [0], [0], [1], [0, 0, 1, 1], [], []>} : vector<104x256xbf16>, vector<256x128xbf16>, vector<104x128xf32> -> vector<104x128xf32>
    %c0_15 = arith.constant 0 : index
    %c0_16 = arith.constant 0 : index
    %20 = vector.load %arg7[%c0_15, %c0_16] : memref<1x128xf32, #tpu.memory_space<vmem>>, vector<1x128xf32>
    %21 = vector.broadcast %20 : vector<1x128xf32> to vector<104x128xf32>
    %22 = arith.addf %19, %21 : vector<104x128xf32>
    %cst_17 = arith.constant 0.000000e+00 : f32
    %23 = vector.broadcast %cst_17 : f32 to vector<104x128xf32>
    %24 = arith.maximumf %22, %23 : vector<104x128xf32>
    %25 = arith.truncf %24 : vector<104x128xf32> to vector<104x128xbf16>
    %c0_18 = arith.constant 0 : index
    %c0_19 = arith.constant 0 : index
    %26 = vector.load %arg8[%c0_18, %c0_19] : memref<128x128xbf16, #tpu.memory_space<vmem>>, vector<128x128xbf16>
    %cst_20 = arith.constant dense<0.000000e+00> : vector<104x128xf32>
    %27 = tpu.matmul %25, %26, %cst_20 {dimension_numbers = #tpu.dot_dimension_numbers<[1], [0], [0], [1], [0, 0, 1, 1], [], []>} : vector<104x128xbf16>, vector<128x128xbf16>, vector<104x128xf32> -> vector<104x128xf32>
    %c0_21 = arith.constant 0 : index
    %c0_22 = arith.constant 0 : index
    %28 = vector.load %arg9[%c0_21, %c0_22] : memref<1x128xf32, #tpu.memory_space<vmem>>, vector<1x128xf32>
    %29 = vector.broadcast %28 : vector<1x128xf32> to vector<104x128xf32>
    %30 = arith.addf %27, %29 : vector<104x128xf32>
    %31 = arith.truncf %30 : vector<104x128xf32> to vector<104x128xbf16>
    %c0_23 = arith.constant 0 : index
    %c0_24 = arith.constant 0 : index
    %32 = vector.load %arg10[%c0_23, %c0_24] : memref<104x128xbf16, #tpu.memory_space<vmem>>, vector<104x128xbf16>
    tpu.vector_store %arg10[%c0_23, %c0_24], %31 {strides = array<i32>} : memref<104x128xbf16, #tpu.memory_space<vmem>>, vector<104x128xbf16>,
    return
  }
  func.func @transform_0(%arg0: i32) -> (i32, i32) {
    %c0_i32 = arith.constant 0 : i32
    %c0_i32_0 = arith.constant 0 : i32
    return %arg0, %c0_i32 : i32, i32
  }
  func.func @transform_1(%arg0: i32) -> (i32, i32) {
    %c0_i32 = arith.constant 0 : i32
    %c0_i32_0 = arith.constant 0 : i32
    %c0_i32_1 = arith.constant 0 : i32
    return %c0_i32, %c0_i32_0 : i32, i32
  }
  func.func @transform_2(%arg0: i32) -> (i32, i32) {
    %c0_i32 = arith.constant 0 : i32
    %c0_i32_0 = arith.constant 0 : i32
    %c0_i32_1 = arith.constant 0 : i32
    return %c0_i32, %c0_i32_0 : i32, i32
  }
  func.func @transform_3(%arg0: i32) -> (i32, i32) {
    %c0_i32 = arith.constant 0 : i32
    %c0_i32_0 = arith.constant 0 : i32
    %c0_i32_1 = arith.constant 0 : i32
    return %c0_i32, %c0_i32_0 : i32, i32
  }
  func.func @transform_4(%arg0: i32) -> (i32, i32) {
    %c0_i32 = arith.constant 0 : i32
    %c0_i32_0 = arith.constant 0 : i32
    %c0_i32_1 = arith.constant 0 : i32
    return %c0_i32, %c0_i32_0 : i32, i32
  }
  func.func @transform_5(%arg0: i32) -> (i32, i32) {
    %c0_i32 = arith.constant 0 : i32
    %c0_i32_0 = arith.constant 0 : i32
    %c0_i32_1 = arith.constant 0 : i32
    return %c0_i32, %c0_i32_0 : i32, i32
  }
  func.func @transform_6(%arg0: i32) -> (i32, i32) {
    %c0_i32 = arith.constant 0 : i32
    %c0_i32_0 = arith.constant 0 : i32
    %c0_i32_1 = arith.constant 0 : i32
    return %c0_i32, %c0_i32_0 : i32, i32
  }
  func.func @transform_7(%arg0: i32) -> (i32, i32) {
    %c0_i32 = arith.constant 0 : i32
    %c0_i32_0 = arith.constant 0 : i32
    %c0_i32_1 = arith.constant 0 : i32
    return %c0_i32, %c0_i32_0 : i32, i32
  }
  func.func @transform_8(%arg0: i32) -> (i32, i32) {
    %c0_i32 = arith.constant 0 : i32
    %c0_i32_0 = arith.constant 0 : i32
    %c0_i32_1 = arith.constant 0 : i32
    return %c0_i32, %c0_i32_0 : i32, i32
  }
  func.func @transform_9(%arg0: i32) -> (i32, i32) {
    %c0_i32 = arith.constant 0 : i32
    %c0_i32_0 = arith.constant 0 : i32
    return %arg0, %c0_i32 : i32, i32
  }
}

</mosaic_0001>

<bundles_post_ra>
// kernel: tpu_custom_call.1
= control target key start
LH: loop header
LB: loop body
LE: loop exit
PB: predicated region body
PF: predicated region fallthrough
CT: control target
= control target key end

     0   :  { %14 = vsyncpa [#allocation3], 0  ;;  %s1855_s0 = inlined_call_operand.vmem [shape: f32[104,42], index: 0, kind: input, shape index: {}]   ;;  %s1856_s1 = inlined_call_operand.hbm [shape: bf16[42,256], index: 1, kind: input, shape index: {}]   ;;  %s1857_s2 = inlined_call_operand.vmem [shape: f32[1,256], index: 2, kind: input, shape index: {}]   ;;  %s1858_s3 = inlined_call_operand.hbm [shape: bf16[256,256], index: 3, kind: input, shape index: {}]   ;;  %s1859_s4 = inlined_call_operand.vmem [shape: f32[1,256], index: 4, kind: input, shape index: {}]   ;;  %s1860_s5 = inlined_call_operand.vmem [shape: bf16[256,128], index: 5, kind: input, shape index: {}]   ;;  %s1861_s6 = inlined_call_operand.vmem [shape: f32[1,128], index: 6, kind: input, shape index: {}]   ;;  %s1862_s7 = inlined_call_operand.hbm [shape: bf16[128,128], index: 7, kind: input, shape index: {}]   ;;  %s1863_s8 = inlined_call_operand.vmem [shape: f32[1,128], index: 8, kind: input, shape index: {}]   ;;  %s1864_s9 = inlined_call_operand.hbm [shape: bf16[104,128], index: 9, kind: output, shape index: {}]  }
   0x1   :  { %15 = vsyncpa [#allocation6], 0 }
   0x2   :  { %16 = vsyncpa [#allocation4], 0  ;;  %s38_s11 = sshll.u32 %s1858_s3, 4  ;;  %s1581_s12 = smov [#allocation5]   ;;  %s39_s11 = int_to_ptr.hbm [resolvable:$true] %s38_s11 }
   0x3   :  { %s40_s13 = sshll.u32 %s1581_s12, 4  ;;  %s23_s16 = sshll.u32 %s1856_s1, 4  ;;  %s41_s13 = int_to_ptr.vmem [resolvable:$true] %s40_s13  ;;  %s24_s16 = int_to_ptr.hbm [resolvable:$true] %s23_s16 }
   0x4   :  { %s1582_s17 = smov 128   ;;  %s1583_s18 = smov 8  }
   0x5   :  { %46 = dma.hbm_to_vmem [thread:$0]  %s39_s11, 4096, %s41_s13, [#allocation6], %s1582_s17, %s1582_s17, %s1583_s18  }
   0x6   :  { %s1584_s19 = smov [#allocation2]   ;;  %s57_s23 = sshll.u32 %s1862_s7, 4  ;;  %s58_s23 = int_to_ptr.hbm [resolvable:$true] %s57_s23 }
   0x7   :  { %s25_s20 = sshll.u32 %s1584_s19, 4  ;;  %s1585_s3 = smov [#allocation7]   ;;  %s26_s20 = int_to_ptr.vmem [resolvable:$true] %s25_s20 }
   0x8   :  { %31 = dma.hbm_to_vmem [thread:$0]  %s24_s16, 768, %s26_s20, [#allocation3], %s1582_s17, %s1582_s17, %s1583_s18  }
   0x9   :  { %s59_s24 = sshll.u32 %s1585_s3, 4  ;;  %s1586_s25 = smov 64   ;;  %s60_s24 = int_to_ptr.vmem [resolvable:$true] %s59_s24 }
   0xa   :  { %s1587_s26 = smov 4  }
   0xb   :  { %65 = dma.hbm_to_vmem [thread:$0]  %s58_s23, 1024, %s60_s24, [#allocation6], %s1586_s25, %s1586_s25, %s1587_s26  }
   0xc   :  { %1575 = dma.done.wait [#allocation3], 768  }
   0xd   :  { %1576 = vsyncadd [#allocation3], 4294966528 }
   0xe   :  { %1577 = dma.done.wait [#allocation6], 5120  }
   0xf   :  { %1578 = vsyncadd [#allocation6], 4294962176  ;;  %v1119_v0 = vld [vmem:[#allocation2 + $0x20] sm:$0xf]  ;;  %v1368_v1 = vld [vmem:[#allocation2 + $0x24] sm:$0x10] }
  0x10   :  { %vm163_vm0 = vcmask 1044480   ;;  %v1120_v2 = vor.u32 %v1368_v1, %v1119_v0  ;;  %v1111_v3 = vld [vmem:[#allocation2 + $0x10] sm:$0xf]  ;;  %v1366_v4 = vld [vmem:[#allocation2 + $0x14] sm:$0xf0]  ;;  %v81_v12 = vld [vmem:[%s1855_s0] sm:$0xff] }
  0x11   :  { %v1367_v6 = vld [vmem:[#allocation2 + $0x24] sm:$0xf]  ;;  %v1121_v7 = vld [vmem:[#allocation2 + $0x28] sm:$0x10]  ;;  %v1112_v8 = vor.u32 %v1366_v4, %v1111_v3  ;;  %v1103_v9 = vld [vmem:[#allocation2] sm:$0xf] }
  0x12   :  { %v165_v5 = vsel %vm163_vm0, %v1120_v2, 0  ;;  %v1364_v10 = vld [vmem:[#allocation2 + $0x4] sm:$0xf0]  ;;  %v1124_v11 = vor.u32 %v1367_v6, %v1121_v7  ;;  %v85_v15 = vld [vmem:[%s1855_s0 + $0x20] sm:$0xff]  ;;  %v1365_v18 = vld [vmem:[#allocation2 + $0x14] sm:$0xf] }
  0x13   :  { %175 = vmatpush.bf16.msra.mxu0 %v165_v5  ;;  %1460 = vmatpush.bf16.msra.mxu1 %v165_v5  ;;  %v1104_v13 = vor.u32 %v1364_v10, %v1103_v9  ;;  %v82_v14 = vld [vmem:[%s1855_s0 + $0x8] sm:$0xff]  ;;  %v1113_v19 = vld [vmem:[#allocation2 + $0x18] sm:$0xf0]  ;;  %vm141_vm1 = vcmask 343040   ;;  %v1363_v23 = vld [vmem:[#allocation2 + $0x4] sm:$0xf] }
  0x14   :  { %1461 = vmatpush.bf16.msra.mxu2 %v165_v5  ;;  %1462 = vmatpush.bf16.msra.mxu3 %v165_v5  ;;  %v86_v16 = vld [vmem:[%s1855_s0 + $0x28] sm:$0xff]  ;;  %v168_v17 = vsel %vm163_vm0, %v1124_v11, 0  ;;  %v94_v20 = vpack.c.bf16 %v82_v14, %v81_v12  ;;  %v1116_v22 = vor.u32 %v1365_v18, %v1113_v19  ;;  %v83_v26 = vld [vmem:[%s1855_s0 + $0x10] sm:$0xff]  ;;  %v84_v27 = vld [vmem:[%s1855_s0 + $0x18] sm:$0xff]  ;;  %s1087_s22 = sshll.u32 %s1864_s9, 4  ;;  %s1088_s22 = int_to_ptr.hbm [resolvable:$true] %s1087_s22 }
  0x15   :  { %v96_v21 = vpack.c.bf16 %v86_v16, %v85_v15  ;;  %v1105_v24 = vld [vmem:[#allocation2 + $0x8] sm:$0xf0]  ;;  %v87_v28 = vld [vmem:[%s1855_s0 + $0x30] sm:$0xff]  ;;  %v88_v29 = vld [vmem:[%s1855_s0 + $0x38] sm:$0xff]  ;;  %v95_v30 = vpack.c.bf16 %v84_v27, %v83_v26 }
  0x16   :  { %v1108_v25 = vor.u32 %v1363_v23, %v1105_v24  ;;  %v97_v31 = vpack.c.bf16 %v88_v29, %v87_v28  ;;  %v1399_v32 = vld [vmem:[#allocation5 + $0xf4] sm:$0xf]  ;;  %v1263_v33 = vld [vmem:[#allocation5 + $0xf8] sm:$0xf0]  ;;  %v1397_v38 = vld [vmem:[#allocation5 + $0xe4] sm:$0xf] }
  0x17   :  { %176 = vmatpush.bf16.msra.mxu0 %v1112_v8  ;;  %1463 = vmatpush.bf16.msra.mxu1 %v1112_v8  ;;  %v89_v34 = vld [vmem:[%s1855_s0 + $0x40] sm:$0xff]  ;;  %v1266_v35 = vor.u32 %v1399_v32, %v1263_v33  ;;  %v90_v36 = vld [vmem:[%s1855_s0 + $0x48] sm:$0xff]  ;;  %v1255_v39 = vld [vmem:[#allocation5 + $0xe8] sm:$0xf0] }
  0x18   :  { %1464 = vmatpush.bf16.msra.mxu2 %v1112_v8  ;;  %1465 = vmatpush.bf16.msra.mxu3 %v1112_v8  ;;  %v1688_v37 = vpack.c.bf16 %v90_v36, %v89_v34  ;;  %v91_v40 = vld [vmem:[%s1855_s0 + $0x50] sm:$0xff]  ;;  %v1258_v41 = vor.u32 %v1397_v38, %v1255_v39  ;;  %v92_v42 = vld [vmem:[%s1855_s0 + $0x58] sm:$0xff]  ;;  %v1395_v44 = vld [vmem:[#allocation5 + $0xd4] sm:$0xf] }
  0x19   :  { %v1699_v43 = vpack.c.bf16 %v92_v42, %v91_v40  ;;  %v1247_v45 = vld [vmem:[#allocation5 + $0xd8] sm:$0xf0]  ;;  %v1197_v46 = vld [vmem:[#allocation5 + $0x70] sm:$0xf]  ;;  %v1384_v48 = vld [vmem:[#allocation5 + $0x74] sm:$0xf0] }
  0x1a   :  { %v1250_v47 = vor.u32 %v1395_v44, %v1247_v45  ;;  %v1383_v49 = vld [vmem:[#allocation5 + $0x74] sm:$0xf]  ;;  %v1199_v50 = vld [vmem:[#allocation5 + $0x78] sm:$0xf0]  ;;  %v1198_v51 = vor.u32 %v1384_v48, %v1197_v46  ;;  %v1393_v53 = vld [vmem:[#allocation5 + $0xc4] sm:$0xf] }
  0x1b   :  { %177 = vmatpush.bf16.msra.mxu0 %v1104_v13  ;;  %1466 = vmatpush.bf16.msra.mxu1 %v1104_v13  ;;  %v1202_v52 = vor.u32 %v1383_v49, %v1199_v50  ;;  %v1239_v54 = vld [vmem:[#allocation5 + $0xc8] sm:$0xf0]  ;;  %v1189_v56 = vld [vmem:[#allocation5 + $0x60] sm:$0xf]  ;;  %v1382_v57 = vld [vmem:[#allocation5 + $0x64] sm:$0xf0] }
  0x1c   :  { %1467 = vmatpush.bf16.msra.mxu2 %v1104_v13  ;;  %1468 = vmatpush.bf16.msra.mxu3 %v1104_v13  ;;  %v1242_v55 = vor.u32 %v1393_v53, %v1239_v54  ;;  %v1381_v58 = vld [vmem:[#allocation5 + $0x64] sm:$0xf]  ;;  %v1190_v59 = vor.u32 %v1382_v57, %v1189_v56  ;;  %v1191_v60 = vld [vmem:[#allocation5 + $0x68] sm:$0xf0]  ;;  %v1181_v62 = vld [vmem:[#allocation5 + $0x50] sm:$0xf] }
  0x1d   :  { %v1194_v61 = vor.u32 %v1381_v58, %v1191_v60  ;;  %v1380_v63 = vld [vmem:[#allocation5 + $0x54] sm:$0xf0]  ;;  %v1379_v0 = vld [vmem:[#allocation5 + $0x54] sm:$0xf]  ;;  %v1183_v2 = vld [vmem:[#allocation5 + $0x58] sm:$0xf0] }
  0x1e   :  { %1125 = vmatmul.msk.bf16.vlgmr.msra.gmra.mxu0 %vm141_vm1, %v94_v20  ;;  %1127 = vmatmul.msk.bf16.vlgmr.msra.gmra.mxu1 %vm141_vm1, %v96_v21  ;;  %v1182_v1 = vor.u32 %v1380_v63, %v1181_v62  ;;  %v1186_v3 = vor.u32 %v1379_v0, %v1183_v2  ;;  %v1173_v4 = vld [vmem:[#allocation5 + $0x40] sm:$0xf]  ;;  %v1378_v5 = vld [vmem:[#allocation5 + $0x44] sm:$0xf0]  ;;  %v1391_v6 = vld [vmem:[#allocation5 + $0xb4] sm:$0xf] }
  0x1f   :  { %218 = vmatpush.bf16.msrb.mxu1 %v168_v17  ;;  %1129 = vmatmul.msk.bf16.vlgmr.msra.gmra.mxu2 %vm141_vm1, %v1688_v37  ;;  %v1377_v7 = vld [vmem:[#allocation5 + $0x44] sm:$0xf]  ;;  %v1175_v8 = vld [vmem:[#allocation5 + $0x48] sm:$0xf0]  ;;  %v1231_v9 = vld [vmem:[#allocation5 + $0xb8] sm:$0xf0]  ;;  %v1174_v11 = vor.u32 %v1378_v5, %v1173_v4 }
  0x20   :  { %494 = vmatpush.bf16.msrb.mxu2 %v1198_v51  ;;  %580 = vmatpush.bf16.msrb.mxu0 %v1202_v52  ;;  %v1234_v10 = vor.u32 %v1391_v6, %v1231_v9  ;;  %v1178_v12 = vor.u32 %v1377_v7, %v1175_v8  ;;  %v1165_v13 = vld [vmem:[#allocation5 + $0x30] sm:$0xf]  ;;  %v1376_v14 = vld [vmem:[#allocation5 + $0x34] sm:$0xf0]  ;;  %v1375_v15 = vld [vmem:[#allocation5 + $0x34] sm:$0xf] }
  0x21   :  { %v1166_v16 = vor.u32 %v1376_v14, %v1165_v13  ;;  %v1167_v17 = vld [vmem:[#allocation5 + $0x38] sm:$0xf0]  ;;  %v1157_v19 = vld [vmem:[#allocation5 + $0x20] sm:$0xf]  ;;  %v1159_v23 = vld [vmem:[#allocation5 + $0x28] sm:$0xf0] }
  0x22   :  { %v1170_v18 = vor.u32 %v1375_v15, %v1167_v17  ;;  %v1372_v26 = vld [vmem:[#allocation5 + $0x14] sm:$0xf0]  ;;  %v1371_v27 = vld [vmem:[#allocation5 + $0x14] sm:$0xf]  ;;  %v1151_v29 = vld [vmem:[#allocation5 + $0x18] sm:$0xf0] }
  0x23   :  { %219 = vmatpush.bf16.msrb.mxu1 %v1116_v22  ;;  %v1141_v33 = vld [vmem:[#allocation5] sm:$0xf]  ;;  %v1370_v34 = vld [vmem:[#allocation5 + $0x4] sm:$0xf0]  ;;  %v1389_v39 = vld [vmem:[#allocation5 + $0xa4] sm:$0xf] }
  0x24   :  { %495 = vmatpush.bf16.msrb.mxu2 %v1190_v59  ;;  %581 = vmatpush.bf16.msrb.mxu0 %v1194_v61  ;;  %v1142_v36 = vor.u32 %v1370_v34, %v1141_v33  ;;  %v1223_v40 = vld [vmem:[#allocation5 + $0xa8] sm:$0xf0]  ;;  %v1261_v42 = vld [vmem:[#allocation5 + $0xf0] sm:$0xf]  ;;  %v1400_v44 = vld [vmem:[#allocation5 + $0xf4] sm:$0xf0] }
  0x25   :  { %v1262_v45 = vor.u32 %v1400_v44, %v1261_v42  ;;  %v1253_v46 = vld [vmem:[#allocation5 + $0xe0] sm:$0xf]  ;;  %v1245_v49 = vld [vmem:[#allocation5 + $0xd0] sm:$0xf]  ;;  %v1396_v50 = vld [vmem:[#allocation5 + $0xd4] sm:$0xf0] }
  0x26   :  { %v1246_v51 = vor.u32 %v1396_v50, %v1245_v49  ;;  %v1237_v52 = vld [vmem:[#allocation5 + $0xc0] sm:$0xf]  ;;  %v1394_v53 = vld [vmem:[#allocation5 + $0xc4] sm:$0xf0]  ;;  %v1215_v56 = vld [vmem:[#allocation5 + $0x98] sm:$0xf0] }
  0x27   :  { %220 = vmatpush.bf16.msrb.mxu1 %v1108_v25  ;;  %v1149_v25 = vld [vmem:[#allocation5 + $0x10] sm:$0xf]  ;;  %537 = vmatpush.bf16.msrb.mxu3 %v1262_v45  ;;  %v1238_v54 = vor.u32 %v1394_v53, %v1237_v52  ;;  %v1392_v59 = vld [vmem:[#allocation5 + $0xb4] sm:$0xf0]  ;;  %v1221_v63 = vld [vmem:[#allocation5 + $0xa0] sm:$0xf] }
  0x28   :  { %496 = vmatpush.bf16.msrb.mxu2 %v1182_v1  ;;  %582 = vmatpush.bf16.msrb.mxu0 %v1186_v3  ;;  %v1150_v28 = vor.u32 %v1372_v26, %v1149_v25  ;;  %v1229_v58 = vld [vmem:[#allocation5 + $0xb0] sm:$0xf]  ;;  %v1390_v0 = vld [vmem:[#allocation5 + $0xa4] sm:$0xf0]  ;;  %v1388_v5 = vld [vmem:[#allocation5 + $0x94] sm:$0xf0] }
  0x29   :  { %v1230_v60 = vor.u32 %v1392_v59, %v1229_v58  ;;  %v1222_v2 = vor.u32 %v1390_v0, %v1221_v63  ;;  %v1213_v4 = vld [vmem:[#allocation5 + $0x90] sm:$0xf]  ;;  %v1205_v13 = vld [vmem:[#allocation5 + $0x80] sm:$0xf]  ;;  %v1386_v15 = vld [vmem:[#allocation5 + $0x84] sm:$0xf0] }
  0x2a   :  { %v1214_v6 = vor.u32 %v1388_v5, %v1213_v4  ;;  %v1206_v17 = vor.u32 %v1386_v15, %v1205_v13  ;;  %v1408_v44 = vld [vmem:[%s1860_s5 + $0x38] sm:$0xff]  ;;  %v1407_v59 = vld [vmem:[%s1860_s5 + $0x30] sm:$0xff] }
  0x2b   :  { %623 = vmatpush.bf16.msra.mxu1 %v1266_v35  ;;  %v1369_v35 = vld [vmem:[#allocation5 + $0x4] sm:$0xf]  ;;  %v1416_v45 = vld [vmem:[%s1860_s5 + $0x78] sm:$0xff] }
  0x2c   :  { %497 = vmatpush.bf16.msrb.mxu2 %v1174_v11  ;;  %583 = vmatpush.bf16.msrb.mxu0 %v1178_v12  ;;  %v1385_v11 = vld [vmem:[#allocation5 + $0x84] sm:$0xf]  ;;  %v1207_v12 = vld [vmem:[#allocation5 + $0x88] sm:$0xf0] }
  0x2d   :  { %v1210_v14 = vor.u32 %v1385_v11, %v1207_v12  ;;  %v1414_v12 = vld [vmem:[%s1860_s5 + $0x68] sm:$0xff] }
  0x2e   :  { %1126 = vmatmul.msk.bf16.gmra.mxu0 %vm141_vm1, %v95_v30  ;;  %1128 = vmatmul.msk.bf16.gmra.mxu1 %vm141_vm1, %v97_v31 }
  0x2f   :  { %624 = vmatpush.bf16.msra.mxu1 %v1258_v41  ;;  %1130 = vmatmul.msk.bf16.gmra.mxu2 %vm141_vm1, %v1699_v43  ;;  %v1226_v41 = vor.u32 %v1389_v39, %v1223_v40 }
  0x30   :  { %498 = vmatpush.bf16.msrb.mxu2 %v1166_v16  ;;  %584 = vmatpush.bf16.msrb.mxu0 %v1170_v18 }
  0x33   :  { %625 = vmatpush.bf16.msra.mxu1 %v1250_v47  ;;  %v1398_v47 = vld [vmem:[#allocation5 + $0xe4] sm:$0xf0] }
  0x34   :  { %v1254_v48 = vor.u32 %v1398_v47, %v1253_v46 }
  0x36   :  { %538 = vmatpush.bf16.msrb.mxu3 %v1254_v48 }
  0x37   :  { %626 = vmatpush.bf16.msra.mxu1 %v1242_v55  ;;  %v1387_v55 = vld [vmem:[#allocation5 + $0x94] sm:$0xf] }
  0x38   :  { %v1218_v57 = vor.u32 %v1387_v55, %v1215_v56 }
  0x3a   :  { %539 = vmatpush.bf16.msrb.mxu3 %v1246_v51 }
  0x3b   :  { %627 = vmatpush.bf16.msra.mxu1 %v1234_v10 }
  0x3e   :  { %1132 = vmatmul.msk.bf16.vlgmr.msrb.gmra.mxu1 %vm141_vm1, %v94_v20  ;;  %v1374_v20 = vld [vmem:[#allocation5 + $0x24] sm:$0xf0]  ;;  %540 = vmatpush.bf16.msrb.mxu3 %v1238_v54 }
  0x3f   :  { %v1158_v22 = vor.u32 %v1374_v20, %v1157_v19  ;;  %628 = vmatpush.bf16.msra.mxu1 %v1226_v41 }
  0x41   :  { %499 = vmatpush.bf16.msrb.mxu2 %v1158_v22 }
  0x42   :  { %541 = vmatpush.bf16.msrb.mxu3 %v1230_v60 }
  0x43   :  { %629 = vmatpush.bf16.msra.mxu1 %v1218_v57 }
  0x45   :  { %500 = vmatpush.bf16.msrb.mxu2 %v1150_v28 }
  0x46   :  { %542 = vmatpush.bf16.msrb.mxu3 %v1222_v2 }
  0x47   :  { %630 = vmatpush.bf16.msra.mxu1 %v1210_v14 }
  0x49   :  { %501 = vmatpush.bf16.msrb.mxu2 %v1142_v36 }
  0x4a   :  { %543 = vmatpush.bf16.msrb.mxu3 %v1214_v6 }
  0x4d   :  { %838 = vmatpush.bf16.msra.mxu2 %v1408_v44 }
  0x4e   :  { %1133 = vmatmul.msk.bf16.gmra.mxu1 %vm141_vm1, %v95_v30  ;;  %v1154_v30 = vor.u32 %v1371_v27, %v1151_v29  ;;  %544 = vmatpush.bf16.msrb.mxu3 %v1206_v17 }
  0x51   :  { %839 = vmatpush.bf16.msra.mxu2 %v1407_v59 }
  0x5e   :  { %1134 = vmatmul.msk.bf16.gmra.mxu1 %vm141_vm1, %v96_v21  ;;  %v1373_v21 = vld [vmem:[#allocation5 + $0x24] sm:$0xf] }
  0x5f   :  { %v1162_v24 = vor.u32 %v1373_v21, %v1159_v23 }
  0x61   :  { %585 = vmatpush.bf16.msrb.mxu0 %v1162_v24 }
  0x65   :  { %586 = vmatpush.bf16.msrb.mxu0 %v1154_v30 }
  0x6e   :  { %1135 = vmatmul.msk.bf16.gmra.mxu1 %vm141_vm1, %v97_v31  ;;  %v93_v31 = vld [vmem:[%s1855_s0 + $0x60] sm:$0xff] }
  0x6f   :  { %v100_v32 = vpack.c.bf16 %v93_v31, %v93_v31 }
  0x71   :  { %1131 = vmatmul.msk.bf16.vlgmr.msra.gmra.mxu3 %vm141_vm1, %v100_v32 }
  0x72   :  { %881 = vmatpush.bf16.msra.mxu3 %v1416_v45 }
  0x7e   :  { %1136 = vmatmul.msk.bf16.gmra.mxu1 %vm141_vm1, %v1688_v37  ;;  %v1143_v37 = vld [vmem:[#allocation5 + $0x8] sm:$0xf0] }
  0x7f   :  { %v1146_v38 = vor.u32 %v1369_v35, %v1143_v37 }
  0x81   :  { %587 = vmatpush.bf16.msrb.mxu0 %v1146_v38 }
  0x8e   :  { %1137 = vmatmul.msk.bf16.gmra.mxu1 %vm141_vm1, %v1699_v43  ;;  %v107_v43 = vld [vmem:[%s1857_s2] sm:$0x3] }
  0x8f   :  { %v1716_v1 = vperm.slane %v107_v43, 0  ;;  %v1723_v29 = vperm.slane %v107_v43, 1 }
  0x9b   :  { %v179_v61 = vpop.f32.mrf.mxu0  ;;  %v189_v62 = vpop.f32.mrf.mxu1 }
  0x9c   :  { %v180_v3 = vadd.f32 %v179_v61, %v1716_v1  ;;  %v190_v31 = vadd.f32 %v189_v62, %v1716_v1  ;;  %v1415_v61 = vld [vmem:[%s1860_s5 + $0x70] sm:$0xff] }
  0x9d   :  { %882 = vmatpush.bf16.msra.mxu3 %v1415_v61 }
  0x9e   :  { %1138 = vmatmul.msk.bf16.gmra.mxu1 %vm141_vm1, %v100_v32  ;;  %v256_v7 = vmax.f32 %v180_v3, 0.0  ;;  %v264_v36 = vmax.f32 %v190_v31, 0.0 }
  0xa1   :  { %883 = vmatpush.bf16.msra.mxu3 %v1414_v12 }
  0xa2   :  { %v199_v42 = vpop.f32.mrf.mxu2 }
  0xa3   :  { %v181_v8 = vpop.f32.mrf.mxu0  ;;  %v191_v9 = vpop.f32.mrf.mxu1  ;;  %v200_v60 = vadd.f32 %v199_v42, %v1716_v1  ;;  %v1411_v42 = vld [vmem:[%s1860_s5 + $0x50] sm:$0xff] }
  0xa4   :  { %v182_v10 = vadd.f32 %v181_v8, %v1716_v1  ;;  %v192_v30 = vadd.f32 %v191_v9, %v1716_v1  ;;  %v1406_v8 = vld [vmem:[%s1860_s5 + $0x28] sm:$0xff] }
  0xa5   :  { %v272_v0 = vmax.f32 %v200_v60, 0.0  ;;  %840 = vmatpush.bf16.msra.mxu2 %v1406_v8  ;;  %v1409_v60 = vld [vmem:[%s1860_s5 + $0x40] sm:$0xff] }
  0xa6   :  { %v258_v16 = vmax.f32 %v182_v10, 0.0  ;;  %v266_v34 = vmax.f32 %v192_v30, 0.0 }
  0xa8   :  { %v282_v18 = vpack.c.bf16 %v258_v16, %v256_v7  ;;  %v286_v39 = vpack.c.bf16 %v266_v34, %v264_v36 }
  0xaa   :  { %502 = vmatmul.bf16.vlgmr.msrb.gmra.mxu2 %v282_v18  ;;  %588 = vmatmul.bf16.vlgmr.msrb.gmra.mxu0 %v282_v18  ;;  %v201_v55 = vpop.f32.mrf.mxu2 }
  0xab   :  { %v184_v19 = vpop.f32.mrf.mxu0  ;;  %v194_v20 = vpop.f32.mrf.mxu1  ;;  %v202_v43 = vadd.f32 %v201_v55, %v1716_v1 }
  0xac   :  { %v185_v21 = vadd.f32 %v184_v19, %v1716_v1  ;;  %v195_v47 = vadd.f32 %v194_v20, %v1716_v1 }
  0xad   :  { %v274_v2 = vmax.f32 %v202_v43, 0.0 }
  0xae   :  { %v260_v24 = vmax.f32 %v185_v21, 0.0  ;;  %v268_v52 = vmax.f32 %v195_v47, 0.0 }
  0xaf   :  { %v290_v7 = vpack.c.bf16 %v274_v2, %v272_v0  ;;  %v328_v2 = vld [vmem:[%s1859_s4] sm:$0x3] }
  0xb2   :  { %v204_v62 = vpop.f32.mrf.mxu2 }
  0xb3   :  { %v186_v22 = vpop.f32.mrf.mxu0  ;;  %v196_v23 = vpop.f32.mrf.mxu1  ;;  %v205_v13 = vadd.f32 %v204_v62, %v1716_v1 }
  0xb4   :  { %v187_v25 = vadd.f32 %v186_v22, %v1716_v1  ;;  %v197_v46 = vadd.f32 %v196_v23, %v1716_v1  ;;  %v1405_v23 = vld [vmem:[%s1860_s5 + $0x20] sm:$0xff] }
  0xb5   :  { %v276_v16 = vmax.f32 %v205_v13, 0.0  ;;  %841 = vmatpush.bf16.msra.mxu2 %v1405_v23 }
  0xb6   :  { %v262_v26 = vmax.f32 %v187_v25, 0.0  ;;  %v270_v50 = vmax.f32 %v197_v46, 0.0 }
  0xb8   :  { %v284_v27 = vpack.c.bf16 %v262_v26, %v260_v24  ;;  %v288_v56 = vpack.c.bf16 %v270_v50, %v268_v52  ;;  %v1413_v24 = vld [vmem:[%s1860_s5 + $0x60] sm:$0xff]  ;;  %v1402_v52 = vld [vmem:[%s1860_s5 + $0x8] sm:$0xff] }
  0xb9   :  { %884 = vmatpush.bf16.msra.mxu3 %v1413_v24 }
  0xba   :  { %507 = vmatmul.bf16.gmra.mxu2 %v284_v27  ;;  %593 = vmatmul.bf16.gmra.mxu0 %v284_v27  ;;  %v206_v11 = vpop.f32.mrf.mxu2  ;;  %v1404_v27 = vld [vmem:[%s1860_s5 + $0x18] sm:$0xff] }
  0xbb   :  { %v222_v28 = vpop.f32.mrf.mxu1  ;;  %v207_v14 = vadd.f32 %v206_v11, %v1716_v1  ;;  %842 = vmatpush.bf16.msra.mxu2 %v1404_v27 }
  0xbc   :  { %v223_v32 = vadd.f32 %v222_v28, %v1723_v29  ;;  %v1412_v28 = vld [vmem:[%s1860_s5 + $0x58] sm:$0xff] }
  0xbd   :  { %v278_v17 = vmax.f32 %v207_v14, 0.0  ;;  %885 = vmatpush.bf16.msra.mxu3 %v1412_v28 }
  0xbe   :  { %v257_v37 = vmax.f32 %v223_v32, 0.0 }
  0xbf   :  { %v292_v22 = vpack.c.bf16 %v278_v17, %v276_v16 }
  0xc1   :  { %886 = vmatpush.bf16.msra.mxu3 %v1411_v42 }
  0xc3   :  { %v224_v33 = vpop.f32.mrf.mxu1 }
  0xc4   :  { %v225_v35 = vadd.f32 %v224_v33, %v1723_v29 }
  0xc6   :  { %v259_v38 = vmax.f32 %v225_v35, 0.0 }
  0xc8   :  { %v283_v40 = vpack.c.bf16 %v259_v38, %v257_v37 }
  0xca   :  { %512 = vmatmul.bf16.gmra.mxu2 %v286_v39  ;;  %545 = vmatmul.bf16.vlgmr.msrb.gmra.mxu3 %v283_v40 }
  0xcb   :  { %598 = vmatmul.bf16.gmra.mxu0 %v286_v39  ;;  %631 = vmatmul.bf16.vlgmr.msra.gmra.mxu1 %v283_v40  ;;  %v227_v41 = vpop.f32.mrf.mxu1 }
  0xcc   :  { %v228_v48 = vadd.f32 %v227_v41, %v1723_v29  ;;  %v1403_v41 = vld [vmem:[%s1860_s5 + $0x10] sm:$0xff] }
  0xcd   :  { %843 = vmatpush.bf16.msra.mxu2 %v1403_v41  ;;  %v1424_v41 = vld [vmem:[#allocation7 + $0x38] sm:$0xff] }
  0xce   :  { %v261_v53 = vmax.f32 %v228_v48, 0.0  ;;  %1012 = vmatpush.bf16.msra.mxu0 %v1424_v41 }
  0xd1   :  { %844 = vmatpush.bf16.msra.mxu2 %v1402_v52 }
  0xd3   :  { %v229_v49 = vpop.f32.mrf.mxu1 }
  0xd4   :  { %v230_v51 = vadd.f32 %v229_v49, %v1723_v29 }
  0xd6   :  { %v263_v54 = vmax.f32 %v230_v51, 0.0 }
  0xd8   :  { %v285_v57 = vpack.c.bf16 %v263_v54, %v261_v53  ;;  %v1410_v53 = vld [vmem:[%s1860_s5 + $0x48] sm:$0xff] }
  0xd9   :  { %887 = vmatpush.bf16.msra.mxu3 %v1410_v53 }
  0xda   :  { %517 = vmatmul.bf16.gmra.mxu2 %v288_v56  ;;  %550 = vmatmul.bf16.gmra.mxu3 %v285_v57 }
  0xdb   :  { %603 = vmatmul.bf16.gmra.mxu0 %v288_v56  ;;  %636 = vmatmul.bf16.gmra.mxu1 %v285_v57  ;;  %v232_v58 = vpop.f32.mrf.mxu1 }
  0xdc   :  { %v233_v63 = vadd.f32 %v232_v58, %v1723_v29 }
  0xdd   :  { %888 = vmatpush.bf16.msra.mxu3 %v1409_v60 }
  0xde   :  { %v265_v5 = vmax.f32 %v233_v63, 0.0 }
  0xe3   :  { %v234_v3 = vpop.f32.mrf.mxu1 }
  0xe4   :  { %v235_v4 = vadd.f32 %v234_v3, %v1723_v29 }
  0xe6   :  { %v267_v6 = vmax.f32 %v235_v4, 0.0 }
  0xe8   :  { %v287_v9 = vpack.c.bf16 %v267_v6, %v265_v5  ;;  %v1798_v5 = vperm.slane %v328_v2, 1 }
  0xea   :  { %555 = vmatmul.bf16.gmra.mxu3 %v287_v9  ;;  %522 = vmatmul.bf16.gmra.mxu2 %v290_v7 }
  0xeb   :  { %641 = vmatmul.bf16.gmra.mxu1 %v287_v9  ;;  %v237_v10 = vpop.f32.mrf.mxu1  ;;  %608 = vmatmul.bf16.gmra.mxu0 %v290_v7  ;;  %v1801_v9 = vperm.slane %v328_v2, 0 }
  0xec   :  { %v238_v15 = vadd.f32 %v237_v10, %v1723_v29 }
  0xee   :  { %v269_v20 = vmax.f32 %v238_v15, 0.0 }
  0xf3   :  { %v239_v18 = vpop.f32.mrf.mxu1 }
  0xf4   :  { %v240_v19 = vadd.f32 %v239_v18, %v1723_v29  ;;  %v209_v36 = vpop.f32.mrf.mxu3 }
  0xf5   :  { %v210_v37 = vadd.f32 %v209_v36, %v1716_v1 }
  0xf6   :  { %v271_v21 = vmax.f32 %v240_v19, 0.0 }
  0xf7   :  { %v280_v39 = vmax.f32 %v210_v37, 0.0 }
  0xf8   :  { %v289_v25 = vpack.c.bf16 %v271_v21, %v269_v20 }
  0xf9   :  { %v294_v40 = vpack.c.bf16 %v280_v39, %v280_v39 }
  0xfa   :  { %560 = vmatmul.bf16.gmra.mxu3 %v289_v25  ;;  %527 = vmatmul.bf16.gmra.mxu2 %v292_v22 }
  0xfb   :  { %646 = vmatmul.bf16.gmra.mxu1 %v289_v25  ;;  %v242_v26 = vpop.f32.mrf.mxu1  ;;  %613 = vmatmul.bf16.gmra.mxu0 %v292_v22 }
  0xfc   :  { %v243_v30 = vadd.f32 %v242_v26, %v1723_v29  ;;  %v211_v44 = vpop.f32.mrf.mxu3 }
  0xfe   :  { %v273_v33 = vmax.f32 %v243_v30, 0.0 }
 0x103   :  { %v244_v31 = vpop.f32.mrf.mxu1 }
 0x104   :  { %v245_v32 = vadd.f32 %v244_v31, %v1723_v29 }
 0x106   :  { %v275_v34 = vmax.f32 %v245_v32, 0.0 }
 0x108   :  { %v291_v35 = vpack.c.bf16 %v275_v34, %v273_v33 }
 0x10a   :  { %565 = vmatmul.bf16.gmra.mxu3 %v291_v35  ;;  %532 = vmatmul.bf16.gmra.mxu2 %v294_v40 }
 0x10b   :  { %651 = vmatmul.bf16.gmra.mxu1 %v291_v35  ;;  %v247_v38 = vpop.f32.mrf.mxu1  ;;  %618 = vmatmul.bf16.gmra.mxu0 %v294_v40 }
 0x10c   :  { %v248_v45 = vadd.f32 %v247_v38, %v1723_v29 }
 0x10e   :  { %v277_v47 = vmax.f32 %v248_v45, 0.0 }
 0x113   :  { %v249_v1 = vpop.f32.mrf.mxu1 }
 0x114   :  { %v250_v46 = vadd.f32 %v249_v1, %v1723_v29 }
 0x116   :  { %v279_v48 = vmax.f32 %v250_v46, 0.0 }
 0x118   :  { %v293_v49 = vpack.c.bf16 %v279_v48, %v277_v47 }
 0x11a   :  { %570 = vmatmul.bf16.gmra.mxu3 %v293_v49 }
 0x11b   :  { %656 = vmatmul.bf16.gmra.mxu1 %v293_v49  ;;  %v252_v50 = vpop.f32.mrf.mxu1 }
 0x11c   :  { %v253_v51 = vadd.f32 %v252_v50, %v1723_v29  ;;  %v1401_v29 = vld [vmem:[%s1860_s5] sm:$0xff] }
 0x11d   :  { %845 = vmatpush.bf16.msra.mxu2 %v1401_v29 }
 0x11e   :  { %v281_v54 = vmax.f32 %v253_v51, 0.0 }
 0x120   :  { %v295_v56 = vpack.c.bf16 %v281_v54, %v281_v54 }
 0x123   :  { %v254_v55 = vpop.f32.mrf.mxu1 }
 0x127   :  { %v589_v57 = vpop.f32.mrf.mxu0 }
 0x128   :  { %v590_v6 = vadd.f32 %v589_v57, %v1798_v5 }
 0x12a   :  { %575 = vmatmul.bf16.gmra.mxu3 %v295_v56 }
 0x12b   :  { %661 = vmatmul.bf16.gmra.mxu1 %v295_v56 }
 0x12d   :  { %v503_v58 = vpop.f32.mrf.mxu2 }
 0x12e   :  { %v504_v15 = vadd.f32 %v503_v58, %v1801_v9 }
 0x12f   :  { %v591_v59 = vpop.f32.mrf.mxu0 }
 0x130   :  { %v592_v10 = vadd.f32 %v591_v59, %v1798_v5  ;;  %v1423_v59 = vld [vmem:[#allocation7 + $0x30] sm:$0xff] }
 0x131   :  { %1013 = vmatpush.bf16.msra.mxu0 %v1423_v59 }
 0x135   :  { %v505_v43 = vpop.f32.mrf.mxu2 }
 0x136   :  { %v506_v18 = vadd.f32 %v505_v43, %v1801_v9 }
 0x137   :  { %v594_v61 = vpop.f32.mrf.mxu0 }
 0x138   :  { %v595_v30 = vadd.f32 %v594_v61, %v1798_v5 }
 0x13d   :  { %v508_v62 = vpop.f32.mrf.mxu2 }
 0x13e   :  { %v509_v38 = vadd.f32 %v508_v62, %v1801_v9 }
 0x13f   :  { %v596_v63 = vpop.f32.mrf.mxu0 }
 0x140   :  { %v597_v33 = vadd.f32 %v596_v63, %v1798_v5 }
 0x145   :  { %v510_v0 = vpop.f32.mrf.mxu2 }
 0x146   :  { %v511_v42 = vadd.f32 %v510_v0, %v1801_v9 }
 0x148   :  { %v599_v3 = vpop.f32.mrf.mxu0  ;;  %v632_v4 = vpop.f32.mrf.mxu1 }
 0x149   :  { %v633_v11 = vadd.f32 %v632_v4, %v590_v6  ;;  %v600_v53 = vadd.f32 %v599_v3, %v1798_v5 }
 0x14b   :  { %v667_v16 = vmax.f32 %v633_v11, 0.0 }
 0x14d   :  { %v513_v7 = vpop.f32.mrf.mxu2  ;;  %v546_v8 = vpop.f32.mrf.mxu3 }
 0x14e   :  { %v547_v19 = vadd.f32 %v546_v8, %v504_v15  ;;  %v514_v60 = vadd.f32 %v513_v7, %v1801_v9 }
 0x150   :  { %v601_v12 = vpop.f32.mrf.mxu0  ;;  %v634_v13 = vpop.f32.mrf.mxu1  ;;  %v666_v24 = vmax.f32 %v547_v19, 0.0 }
 0x151   :  { %v635_v14 = vadd.f32 %v634_v13, %v592_v10  ;;  %v602_v56 = vadd.f32 %v601_v12, %v1798_v5 }
 0x153   :  { %v669_v17 = vmax.f32 %v635_v14, 0.0  ;;  %v1422_v14 = vld [vmem:[#allocation7 + $0x28] sm:$0xff] }
 0x154   :  { %1014 = vmatpush.bf16.msra.mxu0 %v1422_v14 }
 0x155   :  { %v693_v20 = vpack.c.bf16 %v669_v17, %v667_v16  ;;  %v515_v21 = vpop.f32.mrf.mxu2  ;;  %v548_v22 = vpop.f32.mrf.mxu3 }
 0x156   :  { %v549_v23 = vadd.f32 %v548_v22, %v506_v18  ;;  %v516_v63 = vadd.f32 %v515_v21, %v1801_v9 }
 0x157   :  { %889 = vmatmul.bf16.vlgmr.msra.gmra.mxu3 %v693_v20 }
 0x158   :  { %v668_v25 = vmax.f32 %v549_v23, 0.0  ;;  %v604_v26 = vpop.f32.mrf.mxu0  ;;  %v637_v27 = vpop.f32.mrf.mxu1 }
 0x159   :  { %v638_v34 = vadd.f32 %v637_v27, %v595_v30  ;;  %v605_v7 = vadd.f32 %v604_v26, %v1798_v5 }
 0x15a   :  { %v692_v28 = vpack.c.bf16 %v668_v25, %v666_v24 }
 0x15b   :  { %v671_v39 = vmax.f32 %v638_v34, 0.0 }
 0x15c   :  { %846 = vmatmul.bf16.vlgmr.msra.gmra.mxu2 %v692_v28 }
 0x15d   :  { %v518_v31 = vpop.f32.mrf.mxu2  ;;  %v551_v32 = vpop.f32.mrf.mxu3 }
 0x15e   :  { %v552_v44 = vadd.f32 %v551_v32, %v509_v38  ;;  %v519_v20 = vadd.f32 %v518_v31, %v1801_v9 }
 0x160   :  { %v606_v35 = vpop.f32.mrf.mxu0  ;;  %v639_v36 = vpop.f32.mrf.mxu1  ;;  %v670_v48 = vmax.f32 %v552_v44, 0.0 }
 0x161   :  { %v640_v37 = vadd.f32 %v639_v36, %v597_v33  ;;  %v607_v16 = vadd.f32 %v606_v35, %v1798_v5  ;;  %v1421_v36 = vld [vmem:[#allocation7 + $0x20] sm:$0xff] }
 0x162   :  { %1015 = vmatpush.bf16.msra.mxu0 %v1421_v36 }
 0x163   :  { %v673_v40 = vmax.f32 %v640_v37, 0.0 }
 0x165   :  { %v553_v45 = vpop.f32.mrf.mxu3  ;;  %v695_v1 = vpack.c.bf16 %v673_v40, %v671_v39  ;;  %v520_v46 = vpop.f32.mrf.mxu2 }
 0x166   :  { %v554_v47 = vadd.f32 %v553_v45, %v511_v42  ;;  %v521_v24 = vadd.f32 %v520_v46, %v1801_v9 }
 0x167   :  { %894 = vmatmul.bf16.gmra.mxu3 %v695_v1 }
 0x168   :  { %v672_v49 = vmax.f32 %v554_v47, 0.0  ;;  %v642_v50 = vpop.f32.mrf.mxu1  ;;  %v609_v51 = vpop.f32.mrf.mxu0 }
 0x169   :  { %v643_v57 = vadd.f32 %v642_v50, %v600_v53  ;;  %v610_v31 = vadd.f32 %v609_v51, %v1798_v5  ;;  %v1420_v51 = vld [vmem:[#allocation7 + $0x18] sm:$0xff] }
 0x16a   :  { %v694_v52 = vpack.c.bf16 %v672_v49, %v670_v48  ;;  %1016 = vmatpush.bf16.msra.mxu0 %v1420_v51 }
 0x16b   :  { %v675_v61 = vmax.f32 %v643_v57, 0.0 }
 0x16c   :  { %851 = vmatmul.bf16.gmra.mxu2 %v694_v52 }
 0x16d   :  { %v556_v54 = vpop.f32.mrf.mxu3  ;;  %v523_v55 = vpop.f32.mrf.mxu2 }
 0x16e   :  { %v557_v0 = vadd.f32 %v556_v54, %v514_v60  ;;  %v524_v45 = vadd.f32 %v523_v55, %v1801_v9  ;;  %v1419_v55 = vld [vmem:[#allocation7 + $0x10] sm:$0xff] }
 0x16f   :  { %1017 = vmatpush.bf16.msra.mxu0 %v1419_v55 }
 0x170   :  { %v644_v58 = vpop.f32.mrf.mxu1  ;;  %v611_v43 = vpop.f32.mrf.mxu0  ;;  %v674_v6 = vmax.f32 %v557_v0, 0.0 }
 0x171   :  { %v645_v29 = vadd.f32 %v644_v58, %v602_v56  ;;  %v612_v40 = vadd.f32 %v611_v43, %v1798_v5 }
 0x173   :  { %v677_v62 = vmax.f32 %v645_v29, 0.0 }
 0x175   :  { %v558_v2 = vpop.f32.mrf.mxu3  ;;  %v697_v4 = vpack.c.bf16 %v677_v62, %v675_v61  ;;  %v525_v11 = vpop.f32.mrf.mxu2  ;;  %v1418_v61 = vld [vmem:[#allocation7 + $0x8] sm:$0xff] }
 0x176   :  { %v559_v3 = vadd.f32 %v558_v2, %v516_v63  ;;  %v526_v47 = vadd.f32 %v525_v11, %v1801_v9  ;;  %1018 = vmatpush.bf16.msra.mxu0 %v1418_v61 }
 0x177   :  { %899 = vmatmul.bf16.gmra.mxu3 %v697_v4 }
 0x178   :  { %v676_v8 = vmax.f32 %v559_v3, 0.0  ;;  %v647_v10 = vpop.f32.mrf.mxu1  ;;  %v614_v13 = vpop.f32.mrf.mxu0 }
 0x179   :  { %v648_v17 = vadd.f32 %v647_v10, %v605_v7  ;;  %v615_v60 = vadd.f32 %v614_v13, %v1798_v5 }
 0x17a   :  { %v696_v12 = vpack.c.bf16 %v676_v8, %v674_v6 }
 0x17b   :  { %v679_v22 = vmax.f32 %v648_v17, 0.0 }
 0x17c   :  { %856 = vmatmul.bf16.gmra.mxu2 %v696_v12 }
 0x17d   :  { %v561_v15 = vpop.f32.mrf.mxu3  ;;  %v528_v21 = vpop.f32.mrf.mxu2 }
 0x17e   :  { %v562_v25 = vadd.f32 %v561_v15, %v519_v20  ;;  %v529_v4 = vadd.f32 %v528_v21, %v1801_v9 }
 0x180   :  { %v649_v18 = vpop.f32.mrf.mxu1  ;;  %v616_v32 = vpop.f32.mrf.mxu0  ;;  %v678_v26 = vmax.f32 %v562_v25, 0.0 }
 0x181   :  { %v650_v19 = vadd.f32 %v649_v18, %v607_v16  ;;  %v617_v62 = vadd.f32 %v616_v32, %v1798_v5 }
 0x183   :  { %v681_v23 = vmax.f32 %v650_v19, 0.0 }
 0x185   :  { %v563_v27 = vpop.f32.mrf.mxu3  ;;  %v699_v28 = vpack.c.bf16 %v681_v23, %v679_v22  ;;  %v530_v37 = vpop.f32.mrf.mxu2 }
 0x186   :  { %v564_v30 = vadd.f32 %v563_v27, %v521_v24  ;;  %v531_v8 = vadd.f32 %v530_v37, %v1801_v9 }
 0x187   :  { %904 = vmatmul.bf16.gmra.mxu3 %v699_v28 }
 0x188   :  { %v680_v33 = vmax.f32 %v564_v30, 0.0  ;;  %v652_v34 = vpop.f32.mrf.mxu1  ;;  %v619_v39 = vpop.f32.mrf.mxu0  ;;  %v1417_v30 = vld [vmem:[#allocation7] sm:$0xff] }
 0x189   :  { %v653_v41 = vadd.f32 %v652_v34, %v610_v31  ;;  %v620_v13 = vadd.f32 %v619_v39, %v1798_v5  ;;  %1019 = vmatpush.bf16.msra.mxu0 %v1417_v30 }
 0x18a   :  { %v698_v35 = vpack.c.bf16 %v680_v33, %v678_v26  ;;  %v1831_v26 = vld [vmem:[%s1861_s6] ss:$0 sm:$0xff] }
 0x18b   :  { %v683_v1 = vmax.f32 %v653_v41, 0.0 }
 0x18c   :  { %861 = vmatmul.bf16.gmra.mxu2 %v698_v35 }
 0x18d   :  { %v566_v38 = vpop.f32.mrf.mxu3  ;;  %v533_v49 = vpop.f32.mrf.mxu2 }
 0x18e   :  { %v567_v48 = vadd.f32 %v566_v38, %v524_v45  ;;  %v534_v19 = vadd.f32 %v533_v49, %v1801_v9 }
 0x190   :  { %v654_v42 = vpop.f32.mrf.mxu1  ;;  %v621_v54 = vpop.f32.mrf.mxu0  ;;  %v682_v56 = vmax.f32 %v567_v48, 0.0 }
 0x191   :  { %v655_v44 = vadd.f32 %v654_v42, %v612_v40 }
 0x193   :  { %v685_v46 = vmax.f32 %v655_v44, 0.0 }
 0x195   :  { %v701_v50 = vpack.c.bf16 %v685_v46, %v683_v1  ;;  %v568_v52 = vpop.f32.mrf.mxu3  ;;  %v535_v29 = vpop.f32.mrf.mxu2 }
 0x196   :  { %v569_v53 = vadd.f32 %v568_v52, %v526_v47 }
 0x197   :  { %909 = vmatmul.bf16.gmra.mxu3 %v701_v50 }
 0x198   :  { %v684_v57 = vmax.f32 %v569_v53, 0.0  ;;  %v657_v58 = vpop.f32.mrf.mxu1 }
 0x199   :  { %v658_v63 = vadd.f32 %v657_v58, %v615_v60 }
 0x19a   :  { %v700_v59 = vpack.c.bf16 %v684_v57, %v682_v56 }
 0x19b   :  { %v687_v3 = vmax.f32 %v658_v63, 0.0 }
 0x19c   :  { %866 = vmatmul.bf16.gmra.mxu2 %v700_v59 }
 0x19d   :  { %v571_v43 = vpop.f32.mrf.mxu3 }
 0x19e   :  { %v572_v10 = vadd.f32 %v571_v43, %v529_v4 }
 0x1a0   :  { %v659_v0 = vpop.f32.mrf.mxu1  ;;  %v686_v7 = vmax.f32 %v572_v10, 0.0 }
 0x1a1   :  { %v660_v2 = vadd.f32 %v659_v0, %v617_v62 }
 0x1a3   :  { %v689_v6 = vmax.f32 %v660_v2, 0.0 }
 0x1a5   :  { %v703_v11 = vpack.c.bf16 %v689_v6, %v687_v3  ;;  %v573_v12 = vpop.f32.mrf.mxu3 }
 0x1a6   :  { %v574_v14 = vadd.f32 %v573_v12, %v531_v8 }
 0x1a7   :  { %914 = vmatmul.bf16.gmra.mxu3 %v703_v11 }
 0x1a8   :  { %v688_v15 = vmax.f32 %v574_v14, 0.0  ;;  %v662_v16 = vpop.f32.mrf.mxu1 }
 0x1a9   :  { %v663_v18 = vadd.f32 %v662_v16, %v620_v13 }
 0x1aa   :  { %v702_v17 = vpack.c.bf16 %v688_v15, %v686_v7 }
 0x1ab   :  { %v691_v21 = vmax.f32 %v663_v18, 0.0 }
 0x1ac   :  { %871 = vmatmul.bf16.gmra.mxu2 %v702_v17 }
 0x1ad   :  { %v576_v20 = vpop.f32.mrf.mxu3  ;;  %v705_v24 = vpack.c.bf16 %v691_v21, %v691_v21 }
 0x1ae   :  { %v577_v22 = vadd.f32 %v576_v20, %v534_v19 }
 0x1b0   :  { %v664_v23 = vpop.f32.mrf.mxu1  ;;  %v690_v25 = vmax.f32 %v577_v22, 0.0 }
 0x1b2   :  { %v704_v28 = vpack.c.bf16 %v690_v25, %v690_v25 }
 0x1b5   :  { %v578_v27 = vpop.f32.mrf.mxu3 }
 0x1b7   :  { %919 = vmatmul.bf16.gmra.mxu3 %v705_v24 }
 0x1bc   :  { %876 = vmatmul.bf16.gmra.mxu2 %v704_v28 }
 0x1da   :  { %v890_v5 = vpop.f32.mrf.mxu3 }
 0x1df   :  { %v847_v32 = vpop.f32.mrf.mxu2 }
 0x1e0   :  { %v848_v33 = vadd.f32 %v1831_v26, %v847_v32 }
 0x1e2   :  { %v892_v9 = vpop.f32.mrf.mxu3  ;;  %v891_v35 = vadd.f32 %v890_v5, %v848_v33 }
 0x1e4   :  { %v924_v38 = vmax.f32 %v891_v35, 0.0 }
 0x1e7   :  { %v849_v34 = vpop.f32.mrf.mxu2 }
 0x1e8   :  { %v850_v36 = vadd.f32 %v1831_v26, %v849_v34 }
 0x1ea   :  { %v893_v37 = vadd.f32 %v892_v9, %v850_v36  ;;  %v895_v31 = vpop.f32.mrf.mxu3 }
 0x1ec   :  { %v925_v39 = vmax.f32 %v893_v37, 0.0 }
 0x1ee   :  { %v937_v40 = vpack.c.bf16 %v925_v39, %v924_v38 }
 0x1ef   :  { %v852_v41 = vpop.f32.mrf.mxu2 }
 0x1f0   :  { %1020 = vmatmul.bf16.vlgmr.msra.gmra.mxu0 %v937_v40  ;;  %v853_v44 = vadd.f32 %v1831_v26, %v852_v41  ;;  %v1478_v41 = vld [vmem:[%s1863_s8] ss:$0 sm:$0xff]  ;;  %s1588_s8 = smov [#allocation8]  }
 0x1f1   :  { %s1085_s19 = sshll.u32 %s1588_s8, 4  ;;  %s1086_s19 = int_to_ptr.vmem [resolvable:$true] %s1085_s19 }
 0x1f2   :  { %v897_v42 = vpop.f32.mrf.mxu3  ;;  %v896_v1 = vadd.f32 %v895_v31, %v853_v44 }
 0x1f4   :  { %v926_v49 = vmax.f32 %v896_v1, 0.0 }
 0x1f7   :  { %v854_v45 = vpop.f32.mrf.mxu2 }
 0x1f8   :  { %v855_v46 = vadd.f32 %v1831_v26, %v854_v45 }
 0x1fa   :  { %v898_v47 = vadd.f32 %v897_v42, %v855_v46  ;;  %v900_v48 = vpop.f32.mrf.mxu3 }
 0x1fc   :  { %v927_v50 = vmax.f32 %v898_v47, 0.0 }
 0x1fe   :  { %v938_v52 = vpack.c.bf16 %v927_v50, %v926_v49 }
 0x1ff   :  { %v857_v53 = vpop.f32.mrf.mxu2 }
 0x200   :  { %1025 = vmatmul.bf16.gmra.mxu0 %v938_v52  ;;  %v858_v51 = vadd.f32 %v1831_v26, %v857_v53 }
 0x202   :  { %v902_v54 = vpop.f32.mrf.mxu3  ;;  %v901_v57 = vadd.f32 %v900_v48, %v858_v51 }
 0x204   :  { %v928_v55 = vmax.f32 %v901_v57, 0.0 }
 0x207   :  { %v859_v56 = vpop.f32.mrf.mxu2 }
 0x208   :  { %v860_v58 = vadd.f32 %v1831_v26, %v859_v56 }
 0x20a   :  { %v903_v59 = vadd.f32 %v902_v54, %v860_v58  ;;  %v905_v29 = vpop.f32.mrf.mxu3 }
 0x20c   :  { %v929_v60 = vmax.f32 %v903_v59, 0.0 }
 0x20e   :  { %v939_v43 = vpack.c.bf16 %v929_v60, %v928_v55 }
 0x20f   :  { %v862_v61 = vpop.f32.mrf.mxu2 }
 0x210   :  { %1030 = vmatmul.bf16.gmra.mxu0 %v939_v43  ;;  %v863_v63 = vadd.f32 %v1831_v26, %v862_v61 }
 0x212   :  { %v907_v62 = vpop.f32.mrf.mxu3  ;;  %v906_v2 = vadd.f32 %v905_v29, %v863_v63 }
 0x214   :  { %v930_v8 = vmax.f32 %v906_v2, 0.0 }
 0x217   :  { %v864_v0 = vpop.f32.mrf.mxu2 }
 0x218   :  { %v865_v4 = vadd.f32 %v1831_v26, %v864_v0 }
 0x21a   :  { %v908_v3 = vadd.f32 %v907_v62, %v865_v4  ;;  %v910_v6 = vpop.f32.mrf.mxu3 }
 0x21c   :  { %v931_v10 = vmax.f32 %v908_v3, 0.0 }
 0x21e   :  { %v940_v11 = vpack.c.bf16 %v931_v10, %v930_v8 }
 0x21f   :  { %v867_v12 = vpop.f32.mrf.mxu2 }
 0x220   :  { %1035 = vmatmul.bf16.gmra.mxu0 %v940_v11  ;;  %v868_v13 = vadd.f32 %v1831_v26, %v867_v12 }
 0x222   :  { %v912_v14 = vpop.f32.mrf.mxu3  ;;  %v911_v15 = vadd.f32 %v910_v6, %v868_v13 }
 0x224   :  { %v932_v19 = vmax.f32 %v911_v15, 0.0 }
 0x227   :  { %v869_v7 = vpop.f32.mrf.mxu2 }
 0x228   :  { %v870_v16 = vadd.f32 %v1831_v26, %v869_v7 }
 0x22a   :  { %v913_v17 = vadd.f32 %v912_v14, %v870_v16  ;;  %v915_v18 = vpop.f32.mrf.mxu3 }
 0x22c   :  { %v933_v20 = vmax.f32 %v913_v17, 0.0 }
 0x22e   :  { %v941_v21 = vpack.c.bf16 %v933_v20, %v932_v19 }
 0x22f   :  { %v872_v22 = vpop.f32.mrf.mxu2 }
 0x230   :  { %1040 = vmatmul.bf16.gmra.mxu0 %v941_v21  ;;  %v873_v24 = vadd.f32 %v1831_v26, %v872_v22 }
 0x232   :  { %v917_v23 = vpop.f32.mrf.mxu3  ;;  %v916_v27 = vadd.f32 %v915_v18, %v873_v24 }
 0x234   :  { %v934_v32 = vmax.f32 %v916_v27, 0.0 }
 0x237   :  { %v874_v25 = vpop.f32.mrf.mxu2 }
 0x238   :  { %v875_v28 = vadd.f32 %v1831_v26, %v874_v25 }
 0x23a   :  { %v918_v30 = vadd.f32 %v917_v23, %v875_v28  ;;  %v920_v5 = vpop.f32.mrf.mxu3 }
 0x23c   :  { %v935_v9 = vmax.f32 %v918_v30, 0.0 }
 0x23e   :  { %v942_v33 = vpack.c.bf16 %v935_v9, %v934_v32 }
 0x23f   :  { %v877_v34 = vpop.f32.mrf.mxu2 }
 0x240   :  { %1045 = vmatmul.bf16.gmra.mxu0 %v942_v33  ;;  %v878_v35 = vadd.f32 %v1831_v26, %v877_v34 }
 0x242   :  { %v922_v36 = vpop.f32.mrf.mxu3  ;;  %v921_v37 = vadd.f32 %v920_v5, %v878_v35 }
 0x244   :  { %v936_v38 = vmax.f32 %v921_v37, 0.0 }
 0x246   :  { %v943_v39 = vpack.c.bf16 %v936_v38, %v936_v38 }
 0x247   :  { %v879_v31 = vpop.f32.mrf.mxu2 }
 0x250   :  { %1050 = vmatmul.bf16.gmra.mxu0 %v943_v39 }
 0x26d   :  { %v1021_v40 = vpop.f32.mrf.mxu0 }
 0x26e   :  { %v1022_v44 = vadd.f32 %v1478_v41, %v1021_v40 }
 0x275   :  { %v1023_v42 = vpop.f32.mrf.mxu0 }
 0x276   :  { %v1024_v45 = vadd.f32 %v1478_v41, %v1023_v42 }
 0x278   :  { %v1428_v1 = vpack.c.bf16 %v1024_v45, %v1022_v44 }
 0x27a   :  { %1429 = vst [vmem:[#allocation8] sm:$0xff] %v1428_v1  }
 0x27d   :  { %v1026_v46 = vpop.f32.mrf.mxu0 }
 0x27e   :  { %v1027_v48 = vadd.f32 %v1478_v41, %v1026_v46 }
 0x285   :  { %v1028_v47 = vpop.f32.mrf.mxu0 }
 0x286   :  { %v1029_v26 = vadd.f32 %v1478_v41, %v1028_v47 }
 0x288   :  { %v1433_v49 = vpack.c.bf16 %v1029_v26, %v1027_v48 }
 0x28a   :  { %1455 = vst [vmem:[#allocation8 + $0x8] sm:$0xff] %v1433_v49  }
 0x28d   :  { %v1031_v50 = vpop.f32.mrf.mxu0 }
 0x28e   :  { %v1032_v53 = vadd.f32 %v1478_v41, %v1031_v50 }
 0x295   :  { %v1033_v52 = vpop.f32.mrf.mxu0 }
 0x296   :  { %v1034_v54 = vadd.f32 %v1478_v41, %v1033_v52 }
 0x298   :  { %v1438_v51 = vpack.c.bf16 %v1034_v54, %v1032_v53 }
 0x29a   :  { %1456 = vst [vmem:[#allocation8 + $0x10] sm:$0xff] %v1438_v51  }
 0x29d   :  { %v1036_v56 = vpop.f32.mrf.mxu0 }
 0x29e   :  { %v1037_v58 = vadd.f32 %v1478_v41, %v1036_v56 }
 0x2a5   :  { %v1038_v57 = vpop.f32.mrf.mxu0 }
 0x2a6   :  { %v1039_v59 = vadd.f32 %v1478_v41, %v1038_v57 }
 0x2a8   :  { %v1443_v29 = vpack.c.bf16 %v1039_v59, %v1037_v58 }
 0x2aa   :  { %1457 = vst [vmem:[#allocation8 + $0x18] sm:$0xff] %v1443_v29  }
 0x2ad   :  { %v1041_v55 = vpop.f32.mrf.mxu0 }
 0x2ae   :  { %v1042_v43 = vadd.f32 %v1478_v41, %v1041_v55 }
 0x2b5   :  { %v1043_v60 = vpop.f32.mrf.mxu0 }
 0x2b6   :  { %v1044_v61 = vadd.f32 %v1478_v41, %v1043_v60 }
 0x2b8   :  { %v1448_v62 = vpack.c.bf16 %v1044_v61, %v1042_v43 }
 0x2ba   :  { %1458 = vst [vmem:[#allocation8 + $0x20] sm:$0xff] %v1448_v62  }
 0x2bd   :  { %v1046_v63 = vpop.f32.mrf.mxu0 }
 0x2be   :  { %v1047_v2 = vadd.f32 %v1478_v41, %v1046_v63 }
 0x2c5   :  { %v1048_v0 = vpop.f32.mrf.mxu0 }
 0x2c6   :  { %v1049_v4 = vadd.f32 %v1478_v41, %v1048_v0 }
 0x2c8   :  { %v1453_v3 = vpack.c.bf16 %v1049_v4, %v1047_v2 }
 0x2ca   :  { %1459 = vst [vmem:[#allocation8 + $0x28] sm:$0xff] %v1453_v3  }
 0x2cd   :  { %v1051_v6 = vpop.f32.mrf.mxu0 }
 0x2ce   :  { %v1052_v8 = vadd.f32 %v1478_v41, %v1051_v6 }
 0x2d0   :  { %v1067_v10 = vpack.c.bf16 %v1052_v8, %v1052_v8 }
 0x2d2   :  { %1080 = vst [vmem:[#allocation8 + $0x30] sm:$0xf] %v1067_v10 }
 0x2d3   :  { %1093 = dma.vmem_to_hbm [thread:$0]  %s1086_s19, 832, %s1088_s22, [#allocation4], %s1586_s25, %s1586_s25, %s1587_s26  }
 0x2d5   :  { %v1053_v11 = vpop.f32.mrf.mxu0 }
 0x2d6   :  { %1579 = dma.done.wait [#allocation4], 832  }
 0x2d7   :  { %1580 = vsyncadd [#allocation4], 4294966464 }
 0x2d8   :  { %1098 = vsyncpa [#allocation3], 1 }
 0x2d9   :  { %1099 = vsyncpa [#allocation6], 1 }
 0x2da   :  { %1100 = vsyncpa [#allocation4], 1 }

</bundles_post_ra>
